<compile_context>
chip_gen: v5e
topology: v5e:2x2
jax: 0.10.0
libtpu: 0.0.40
codegen_flags: <defaults>
</compile_context>

<pallas_src>
import jax
import jax.numpy as jnp
from jax import lax
from jax.experimental import pallas as pl
from jax.experimental.pallas import tpu as pltpu

_LANES = 128
_SUBLANES = 8


def _make_partial_kernel(beta, rows_total, tile_r, needs_mask):
    """Build the per-block partial-sum kernel, specialized on static params."""
    beta = float(beta)
    half_inv_beta = 0.5 / beta
    half_beta = 0.5 * beta

    def kernel(pred_ref, targ_ref, out_ref):
        # pred_ref / targ_ref: (tile_r, 128) blocks; out_ref: (1, 1, 128) partial.
        diff = pred_ref[...].astype(jnp.float32) - targ_ref[...].astype(jnp.float32)
        abs_diff = jnp.abs(diff)
        # Huber: 0.5*d^2/beta for |d| < beta, |d| - 0.5*beta otherwise.
        elem = jnp.where(abs_diff < beta, half_inv_beta * diff * diff,
                         abs_diff - half_beta)
        if needs_mask:
            # Only the final grid step can run past the logical row count;
            # zero whatever the ragged-edge DMA left in those sublanes.
            row_ids = lax.broadcasted_iota(jnp.int32, elem.shape, 0)
            valid_rows = rows_total - pl.program_id(0) * tile_r
            elem = jnp.where(row_ids < valid_rows, elem, 0.0)
        # Reduce only the sublane axis (VPU adds + one cheap XLU reduce); keep
        # the 128 lanes so the store is lane-dense.
        out_ref[0] = jnp.sum(elem, axis=0, keepdims=True)

    return kernel


def smooth_l1_loss(predictions, targets, beta=1.0):
    assert predictions.shape == targets.shape
    n_elem = predictions.size

    # Keep bf16/f32 inputs in their native dtype (upcast happens in-kernel);
    # anything else falls back to f32.
    dtype = predictions.dtype
    if dtype not in (jnp.dtype(jnp.float32), jnp.dtype(jnp.bfloat16)):
        dtype = jnp.dtype(jnp.float32)
        predictions = predictions.astype(dtype)
    targets = targets.astype(dtype)
    itemsize = jnp.dtype(dtype).itemsize

    flat_p = predictions.reshape(-1)
    flat_t = targets.reshape(-1)

    # Logical row count of the lane-dense (rows, 128) view, rounded up to a
    # multiple of 8 so the 2D layout is (8, 128)-tileable.
    rows = ((pl.cdiv(n_elem, _LANES) + _SUBLANES - 1) // _SUBLANES) * _SUBLANES
    pad = rows * _LANES - n_elem
    if pad:
        # Fallback for numel not a multiple of 1024: minimal zero pad (the
        # zeros give diff == 0 and add nothing to the sum).
        flat_p = jnp.concatenate([flat_p, jnp.zeros((pad,), dtype)])
        flat_t = jnp.concatenate([flat_t, jnp.zeros((pad,), dtype)])

    pred2d = flat_p.reshape(rows, _LANES)
    targ2d = flat_t.reshape(rows, _LANES)

    # ~4 MiB per input block -> 2 inputs x 2 pipeline buffers ~= 16 MiB in flight.
    target_block_bytes = 4 * 1024 * 1024
    max_tile_r = max(_SUBLANES,
                     (target_block_bytes // (_LANES * itemsize))
                     // _SUBLANES * _SUBLANES)
    grid = pl.cdiv(rows, max_tile_r)
    tile_r = ((pl.cdiv(rows, grid) + _SUBLANES - 1) // _SUBLANES) * _SUBLANES
    grid = pl.cdiv(rows, tile_r)
    needs_mask = (grid * tile_r) != rows

    kernel = _make_partial_kernel(beta, rows, tile_r, needs_mask)

    partials = pl.pallas_call(
        kernel,
        out_shape=jax.ShapeDtypeStruct((grid, 1, _LANES), jnp.float32),
        grid_spec=pltpu.PrefetchScalarGridSpec(
            num_scalar_prefetch=0,
            grid=(grid,),
            in_specs=[
                pl.BlockSpec((tile_r, _LANES), lambda i: (i, 0)),
                pl.BlockSpec((tile_r, _LANES), lambda i: (i, 0)),
            ],
            out_specs=pl.BlockSpec((1, 1, _LANES), lambda i: (i, 0, 0)),
        ),
        compiler_params=pltpu.CompilerParams(
            # Independent per-block partials -> parallel axis (lets v7x use
            # both TensorCores; harmless on single-TC v5e/v6e).
            dimension_semantics=("parallel",),
            # Safe everywhere: raises v5e's 16 MiB scoped default, stays within
            # v7x's 64 MiB physical VMEM.
            vmem_limit_bytes=32 * 1024 * 1024,
        ),
    )(pred2d, targ2d)

    # Tiny final reduction + mean in plain JAX.
    return jnp.sum(partials) / jnp.float32(n_elem)


def _ref_loss(p, t, beta=1.0):
    d = (p - t).astype(jnp.float32)
    a = jnp.abs(d)
    return jnp.mean(jnp.where(a < beta, 0.5 * d * d / beta, a - 0.5 * beta))


if __name__ == "__main__":
    key = jax.random.PRNGKey(0)
    k1, k2 = jax.random.split(key)

    # Small shape consistent with an elementwise loss over a dense tensor.
    shape = (128, 512)
    predictions = jax.random.normal(k1, shape, dtype=jnp.float32)
    targets = jax.random.normal(k2, shape, dtype=jnp.float32)

    loss = smooth_l1_loss(predictions, targets, beta=1.0)
    jax.block_until_ready(loss)
    ref = _ref_loss(predictions, targets, beta=1.0)
    assert jnp.allclose(loss, ref, rtol=1e-5, atol=1e-6), (loss, ref)

    # Also exercise the non-1024-multiple (padded) path.
    shape2 = (7, 333)
    p2 = jax.random.normal(k1, shape2, dtype=jnp.float32)
    t2 = jax.random.normal(k2, shape2, dtype=jnp.float32)
    loss2 = smooth_l1_loss(p2, t2, beta=1.0)
    jax.block_until_ready(loss2)
    ref2 = _ref_loss(p2, t2, beta=1.0)
    assert jnp.allclose(loss2, ref2, rtol=1e-5, atol=1e-6), (loss2, ref2)

    print("KERNEL_OK")
</pallas_src>

<mosaic_0001>
module attributes {stable_mosaic.version = 11 : i64} {
  func.func @kernel(%arg0: i32, %arg1: memref<512x128xf32, #tpu.memory_space<vmem>>, %arg2: memref<512x128xf32, #tpu.memory_space<vmem>>, %arg3: memref<1x1x128xf32, #tpu.memory_space<vmem>>) attributes {dimension_semantics = [#tpu.dimension_semantics<parallel>], iteration_bounds = array<i64: 1>, scalar_prefetch = 0 : i64, scratch_operands = 0 : i64, tpu.core_type = #tpu.core_type<tc>, window_params = [{transform_indices = @transform_0, window_bounds = array<i64: 512, 128>}, {transform_indices = @transform_1, window_bounds = array<i64: 512, 128>}, {transform_indices = @transform_2, window_bounds = array<i64: 1, 1, 128>}]} {
    %c0 = arith.constant 0 : index
    %c0_0 = arith.constant 0 : index
    %0 = vector.load %arg1[%c0, %c0_0] : memref<512x128xf32, #tpu.memory_space<vmem>>, vector<512x128xf32>
    %c0_1 = arith.constant 0 : index
    %c0_2 = arith.constant 0 : index
    %1 = vector.load %arg2[%c0_1, %c0_2] : memref<512x128xf32, #tpu.memory_space<vmem>>, vector<512x128xf32>
    %2 = arith.subf %0, %1 : vector<512x128xf32>
    %3 = math.absf %2 : vector<512x128xf32>
    %cst = arith.constant 1.000000e+00 : f32
    %4 = vector.broadcast %cst : f32 to vector<512x128xf32>
    %5 = arith.cmpf olt, %3, %4 : vector<512x128xf32>
    %cst_3 = arith.constant 5.000000e-01 : f32
    %6 = vector.broadcast %cst_3 : f32 to vector<512x128xf32>
    %7 = arith.mulf %6, %2 : vector<512x128xf32>
    %8 = arith.mulf %7, %2 : vector<512x128xf32>
    %cst_4 = arith.constant 5.000000e-01 : f32
    %9 = vector.broadcast %cst_4 : f32 to vector<512x128xf32>
    %10 = arith.subf %3, %9 : vector<512x128xf32>
    %11 = arith.select %5, %8, %10 : vector<512x128xi1>, vector<512x128xf32>
    %cst_5 = arith.constant dense<0.000000e+00> : vector<128xf32>
    %12 = vector.multi_reduction <add>, %11, %cst_5 [0] : vector<512x128xf32> to vector<128xf32>
    %13 = vector.shape_cast %12 : vector<128xf32> to vector<1x128xf32>
    %c0_6 = arith.constant 0 : index
    %c0_7 = arith.constant 0 : index
    %c0_8 = arith.constant 0 : index
    %14 = vector.load %arg3[%c0_6, %c0_7, %c0_8] : memref<1x1x128xf32, #tpu.memory_space<vmem>>, vector<1x1x128xf32>
    %15 = vector.shape_cast %14 : vector<1x1x128xf32> to vector<1x128xf32>
    %16 = vector.shape_cast %13 : vector<1x128xf32> to vector<1x1x128xf32>
    tpu.vector_store %arg3[%c0_6, %c0_7, %c0_8], %16 {strides = array<i32>} : memref<1x1x128xf32, #tpu.memory_space<vmem>>, vector<1x1x128xf32>,
    return
  }
  func.func @transform_0(%arg0: i32) -> (i32, i32) {
    %c0_i32 = arith.constant 0 : i32
    %c0_i32_0 = arith.constant 0 : i32
    return %arg0, %c0_i32 : i32, i32
  }
  func.func @transform_1(%arg0: i32) -> (i32, i32) {
    %c0_i32 = arith.constant 0 : i32
    %c0_i32_0 = arith.constant 0 : i32
    return %arg0, %c0_i32 : i32, i32
  }
  func.func @transform_2(%arg0: i32) -> (i32, i32, i32) {
    %c0_i32 = arith.constant 0 : i32
    %c0_i32_0 = arith.constant 0 : i32
    %c0_i32_1 = arith.constant 0 : i32
    return %arg0, %c0_i32, %c0_i32_0 : i32, i32, i32
  }
}

</mosaic_0001>

<bundles_post_ra>
// kernel: tpu_custom_call.1
= control target key start
LH: loop header
LB: loop body
LE: loop exit
PB: predicated region body
PF: predicated region fallthrough
CT: control target
= control target key end

     0   :  { %7 = vsyncpa [#allocation3], 0  ;;  %s1250_s0 = inlined_call_operand.hbm [shape: f32[512,128], index: 0, kind: input, shape index: {}]   ;;  %s1251_s1 = inlined_call_operand.hbm [shape: f32[512,128], index: 1, kind: input, shape index: {}]   ;;  %s1252_s2 = inlined_call_operand.hbm [shape: f32[1,1,128], index: 2, kind: output, shape index: {}]  }
   0x1   :  { %8 = vsyncpa [#allocation6], 0 }
   0x2   :  { %9 = vsyncpa [#allocation4], 0  ;;  %s14_s11 = sshll.u32 %s1250_s0, 4  ;;  %s855_s12 = smov [#allocation2]   ;;  %s15_s11 = int_to_ptr.hbm [resolvable:$true] %s14_s11 }
   0x3   :  { %s16_s13 = sshll.u32 %s855_s12, 4  ;;  %s27_s16 = sshll.u32 %s1251_s1, 4  ;;  %s17_s13 = int_to_ptr.vmem [resolvable:$true] %s16_s13  ;;  %s28_s16 = int_to_ptr.hbm [resolvable:$true] %s27_s16 }
   0x4   :  { %s856_s17 = smov 128   ;;  %s857_s18 = smov 8  }
   0x5   :  { %22 = dma.hbm_to_vmem [thread:$0]  %s15_s11, 8192, %s17_s13, [#allocation3], %s856_s17, %s856_s17, %s857_s18  }
   0x6   :  { %s858_s19 = smov [#allocation5]  }
   0x7   :  { %s29_s20 = sshll.u32 %s858_s19, 4  ;;  %s30_s20 = int_to_ptr.vmem [resolvable:$true] %s29_s20 }
   0x8   :  { %35 = dma.hbm_to_vmem [thread:$0]  %s28_s16, 8192, %s30_s20, [#allocation6], %s856_s17, %s856_s17, %s857_s18  }
   0x9   :  { %849 = dma.done.wait [#allocation3], 8192  }
   0xa   :  { %850 = vsyncadd [#allocation3], 4294959104 }
   0xb   :  { %851 = dma.done.wait [#allocation6], 8192  }
   0xc   :  { %852 = vsyncadd [#allocation6], 4294959104  ;;  %v44_v0 = vld [vmem:[#allocation2] sm:$0xff]  ;;  %v45_v1 = vld [vmem:[#allocation2 + $0x8] sm:$0xff]  ;;  %s859_s0 = smov [#allocation7]   ;;  %s697_s23 = sshll.u32 %s1252_s2, 4  ;;  %s698_s23 = int_to_ptr.hbm [resolvable:$true] %s697_s23 }
   0xd   :  { %v108_v2 = vld [vmem:[#allocation5] sm:$0xff]  ;;  %v109_v3 = vld [vmem:[#allocation5 + $0x8] sm:$0xff]  ;;  %v46_v4 = vld [vmem:[#allocation2 + $0x10] sm:$0xff]  ;;  %s695_s1 = sshll.u32 %s859_s0, 4  ;;  %s696_s1 = int_to_ptr.vmem [resolvable:$true] %s695_s1 }
   0xe   :  { %v110_v5 = vld [vmem:[#allocation5 + $0x10] sm:$0xff]  ;;  %v47_v6 = vld [vmem:[#allocation2 + $0x18] sm:$0xff]  ;;  %v172_v8 = vsub.f32 %v44_v0, %v108_v2  ;;  %v173_v9 = vsub.f32 %v45_v1, %v109_v3  ;;  %v48_v10 = vld [vmem:[#allocation2 + $0x20] sm:$0xff] }
   0xf   :  { %v111_v7 = vld [vmem:[#allocation5 + $0x18] sm:$0xff]  ;;  %v174_v11 = vsub.f32 %v46_v4, %v110_v5  ;;  %v49_v12 = vld [vmem:[#allocation2 + $0x28] sm:$0xff]  ;;  %v112_v13 = vld [vmem:[#allocation5 + $0x20] sm:$0xff] }
  0x10   :  { %v113_v14 = vld [vmem:[#allocation5 + $0x28] sm:$0xff]  ;;  %v175_v15 = vsub.f32 %v47_v6, %v111_v7  ;;  %v236_v16 = vand.u32 2147483647, %v172_v8  ;;  %v237_v17 = vand.u32 2147483647, %v173_v9  ;;  %v364_v18 = vmul.f32 0.5, %v172_v8 }
  0x11   :  { %v365_v19 = vmul.f32 0.5, %v173_v9  ;;  %v50_v20 = vld [vmem:[#allocation2 + $0x30] sm:$0xff]  ;;  %v176_v22 = vsub.f32 %v48_v10, %v112_v13  ;;  %v238_v23 = vand.u32 2147483647, %v174_v11  ;;  %v366_v24 = vmul.f32 0.5, %v174_v11  ;;  %v51_v28 = vld [vmem:[#allocation2 + $0x38] sm:$0xff] }
  0x12   :  { %v114_v21 = vld [vmem:[#allocation5 + $0x30] sm:$0xff]  ;;  %v177_v25 = vsub.f32 %v49_v12, %v113_v14  ;;  %v239_v26 = vand.u32 2147483647, %v175_v15  ;;  %v367_v27 = vmul.f32 0.5, %v175_v15  ;;  %v115_v29 = vld [vmem:[#allocation5 + $0x38] sm:$0xff]  ;;  %v428_v30 = vmul.f32 %v364_v18, %v172_v8  ;;  %v52_v37 = vld [vmem:[#allocation2 + $0x40] sm:$0xff] }
  0x13   :  { %v429_v31 = vmul.f32 %v365_v19, %v173_v9  ;;  %v708_v32 = vadd.f32 -0.5, %v236_v16  ;;  %v709_v33 = vadd.f32 -0.5, %v237_v17  ;;  %v178_v34 = vsub.f32 %v50_v20, %v114_v21  ;;  %v116_v38 = vld [vmem:[#allocation5 + $0x40] sm:$0xff]  ;;  %v53_v47 = vld [vmem:[#allocation2 + $0x48] sm:$0xff]  ;;  %v54_v56 = vld [vmem:[#allocation2 + $0x50] sm:$0xff] }
  0x14   :  { %vm881_vm0 = vcmp.lt.f32.partialorder %v236_v16, 1.0  ;;  %vm885_vm1 = vcmp.lt.f32.partialorder %v237_v17, 1.0  ;;  %v240_v39 = vand.u32 2147483647, %v176_v22  ;;  %v368_v40 = vmul.f32 0.5, %v176_v22  ;;  %v117_v48 = vld [vmem:[#allocation5 + $0x48] sm:$0xff] }
  0x15   :  { %v430_v41 = vmul.f32 %v366_v24, %v174_v11  ;;  %v710_v42 = vadd.f32 -0.5, %v238_v23  ;;  %v179_v43 = vsub.f32 %v51_v28, %v115_v29  ;;  %v241_v44 = vand.u32 2147483647, %v177_v25  ;;  %v118_v57 = vld [vmem:[#allocation5 + $0x50] sm:$0xff]  ;;  %v55_v2 = vld [vmem:[#allocation2 + $0x58] sm:$0xff]  ;;  %v56_v12 = vld [vmem:[#allocation2 + $0x60] sm:$0xff] }
  0x16   :  { %vm889_vm2 = vcmp.lt.f32.partialorder %v238_v23, 1.0  ;;  %v369_v46 = vmul.f32 0.5, %v177_v25  ;;  %v431_v49 = vmul.f32 %v367_v27, %v175_v15  ;;  %v711_v50 = vadd.f32 -0.5, %v239_v26  ;;  %v119_v3 = vld [vmem:[#allocation5 + $0x58] sm:$0xff]  ;;  %v120_v13 = vld [vmem:[#allocation5 + $0x60] sm:$0xff]  ;;  %v121_v23 = vld [vmem:[#allocation5 + $0x68] sm:$0xff] }
  0x17   :  { %v556_v51 = vsel %vm881_vm0, %v428_v30, %v708_v32  ;;  %v557_v52 = vsel %vm885_vm1, %v429_v31, %v709_v33  ;;  %v180_v53 = vsub.f32 %v52_v37, %v116_v38  ;;  %v242_v54 = vand.u32 2147483647, %v178_v34  ;;  %v58_v32 = vld [vmem:[#allocation2 + $0x70] sm:$0xff] }
  0x18   :  { %vm897_vm3 = vcmp.lt.f32.partialorder %v239_v26, 1.0  ;;  %v370_v58 = vmul.f32 0.5, %v178_v34  ;;  %v432_v59 = vmul.f32 %v368_v40, %v176_v22  ;;  %v712_v60 = vadd.f32 -0.5, %v240_v39  ;;  %v57_v22 = vld [vmem:[#allocation2 + $0x68] sm:$0xff]  ;;  %v122_v33 = vld [vmem:[#allocation5 + $0x70] sm:$0xff] }
  0x19   :  { %v558_v61 = vsel %vm889_vm2, %v430_v41, %v710_v42  ;;  %v181_v62 = vsub.f32 %v53_v47, %v117_v48  ;;  %v243_v63 = vand.u32 2147483647, %v179_v43  ;;  %vm903_vm4 = vcmp.lt.f32.partialorder %v240_v39, 1.0  ;;  %v59_v42 = vld [vmem:[#allocation2 + $0x78] sm:$0xff] }
  0x1a   :  { %v620_v1 = vadd.f32 %v557_v52, %v556_v51  ;;  %v371_v4 = vmul.f32 0.5, %v179_v43  ;;  %v433_v5 = vmul.f32 %v369_v46, %v177_v25  ;;  %v713_v6 = vadd.f32 -0.5, %v241_v44  ;;  %v60_v52 = vld [vmem:[#allocation2 + $0x80] sm:$0xff] }
  0x1b   :  { %v559_v7 = vsel %vm897_vm3, %v431_v49, %v711_v50  ;;  %v182_v8 = vsub.f32 %v54_v56, %v118_v57  ;;  %v244_v9 = vand.u32 2147483647, %v180_v53  ;;  %vm909_vm5 = vcmp.lt.f32.partialorder %v241_v44, 1.0 }
  0x1c   :  { %v621_v11 = vadd.f32 %v620_v1, %v558_v61  ;;  %v372_v14 = vmul.f32 0.5, %v180_v53  ;;  %v434_v15 = vmul.f32 %v370_v58, %v178_v34  ;;  %v714_v16 = vadd.f32 -0.5, %v242_v54 }
  0x1d   :  { %v560_v17 = vsel %vm903_vm4, %v432_v59, %v712_v60  ;;  %v183_v18 = vsub.f32 %v55_v2, %v119_v3  ;;  %v245_v19 = vand.u32 2147483647, %v181_v62  ;;  %vm915_vm6 = vcmp.lt.f32.partialorder %v242_v54, 1.0 }
  0x1e   :  { %v622_v21 = vadd.f32 %v621_v11, %v559_v7  ;;  %v373_v24 = vmul.f32 0.5, %v181_v62  ;;  %v435_v25 = vmul.f32 %v371_v4, %v179_v43  ;;  %v715_v26 = vadd.f32 -0.5, %v243_v63  ;;  %v123_v43 = vld [vmem:[#allocation5 + $0x78] sm:$0xff] }
  0x1f   :  { %v561_v27 = vsel %vm909_vm5, %v433_v5, %v713_v6  ;;  %v184_v28 = vsub.f32 %v56_v12, %v120_v13  ;;  %v246_v29 = vand.u32 2147483647, %v182_v8  ;;  %vm921_vm7 = vcmp.lt.f32.partialorder %v243_v63, 1.0  ;;  %v125_v63 = vld [vmem:[#allocation5 + $0x88] sm:$0xff] }
  0x20   :  { %v623_v31 = vadd.f32 %v622_v21, %v560_v17  ;;  %v374_v34 = vmul.f32 0.5, %v182_v8  ;;  %v436_v35 = vmul.f32 %v372_v14, %v180_v53  ;;  %v716_v36 = vadd.f32 -0.5, %v244_v9  ;;  %v124_v53 = vld [vmem:[#allocation5 + $0x80] sm:$0xff] }
  0x21   :  { %v562_v37 = vsel %vm915_vm6, %v434_v15, %v714_v16  ;;  %v185_v38 = vsub.f32 %v57_v22, %v121_v23  ;;  %v247_v39 = vand.u32 2147483647, %v183_v18  ;;  %vm927_vm8 = vcmp.lt.f32.partialorder %v244_v9, 1.0  ;;  %v126_v9 = vld [vmem:[#allocation5 + $0x90] sm:$0xff] }
  0x22   :  { %v624_v41 = vadd.f32 %v623_v31, %v561_v27  ;;  %v375_v44 = vmul.f32 0.5, %v183_v18  ;;  %v437_v45 = vmul.f32 %v373_v24, %v181_v62  ;;  %v717_v46 = vadd.f32 -0.5, %v245_v19  ;;  %v61_v62 = vld [vmem:[#allocation2 + $0x88] sm:$0xff] }
  0x23   :  { %v563_v47 = vsel %vm921_vm7, %v435_v25, %v715_v26  ;;  %v186_v48 = vsub.f32 %v58_v32, %v122_v33  ;;  %v248_v49 = vand.u32 2147483647, %v184_v28  ;;  %vm933_vm9 = vcmp.lt.f32.partialorder %v245_v19, 1.0  ;;  %v127_v19 = vld [vmem:[#allocation5 + $0x98] sm:$0xff] }
  0x24   :  { %v625_v51 = vadd.f32 %v624_v41, %v562_v37  ;;  %v376_v54 = vmul.f32 0.5, %v184_v28  ;;  %v438_v55 = vmul.f32 %v374_v34, %v182_v8  ;;  %v718_v56 = vadd.f32 -0.5, %v246_v29  ;;  %v62_v8 = vld [vmem:[#allocation2 + $0x90] sm:$0xff] }
  0x25   :  { %v564_v57 = vsel %vm927_vm8, %v436_v35, %v716_v36  ;;  %v187_v58 = vsub.f32 %v59_v42, %v123_v43  ;;  %v249_v59 = vand.u32 2147483647, %v185_v38  ;;  %vm939_vm10 = vcmp.lt.f32.partialorder %v246_v29, 1.0  ;;  %v128_v29 = vld [vmem:[#allocation5 + $0xa0] sm:$0xff] }
  0x26   :  { %v626_v61 = vadd.f32 %v625_v51, %v563_v47  ;;  %v377_v0 = vmul.f32 0.5, %v185_v38  ;;  %v439_v1 = vmul.f32 %v375_v44, %v183_v18  ;;  %v719_v2 = vadd.f32 -0.5, %v247_v39  ;;  %v63_v18 = vld [vmem:[#allocation2 + $0x98] sm:$0xff] }
  0x27   :  { %v565_v3 = vsel %vm933_vm9, %v437_v45, %v717_v46  ;;  %v188_v4 = vsub.f32 %v60_v52, %v124_v53  ;;  %v250_v5 = vand.u32 2147483647, %v186_v48  ;;  %vm945_vm11 = vcmp.lt.f32.partialorder %v247_v39, 1.0  ;;  %v129_v39 = vld [vmem:[#allocation5 + $0xa8] sm:$0xff] }
  0x28   :  { %v627_v7 = vadd.f32 %v626_v61, %v564_v57  ;;  %v378_v10 = vmul.f32 0.5, %v186_v48  ;;  %v440_v11 = vmul.f32 %v376_v54, %v184_v28  ;;  %v720_v12 = vadd.f32 -0.5, %v248_v49  ;;  %v64_v28 = vld [vmem:[#allocation2 + $0xa0] sm:$0xff] }
  0x29   :  { %v566_v13 = vsel %vm939_vm10, %v438_v55, %v718_v56  ;;  %v189_v14 = vsub.f32 %v61_v62, %v125_v63  ;;  %v251_v15 = vand.u32 2147483647, %v187_v58  ;;  %vm951_vm12 = vcmp.lt.f32.partialorder %v248_v49, 1.0  ;;  %v130_v49 = vld [vmem:[#allocation5 + $0xb0] sm:$0xff] }
  0x2a   :  { %v628_v17 = vadd.f32 %v627_v7, %v565_v3  ;;  %v379_v20 = vmul.f32 0.5, %v187_v58  ;;  %v441_v21 = vmul.f32 %v377_v0, %v185_v38  ;;  %v721_v22 = vadd.f32 -0.5, %v249_v59  ;;  %v65_v38 = vld [vmem:[#allocation2 + $0xa8] sm:$0xff] }
  0x2b   :  { %v567_v23 = vsel %vm945_vm11, %v439_v1, %v719_v2  ;;  %v190_v24 = vsub.f32 %v62_v8, %v126_v9  ;;  %v252_v25 = vand.u32 2147483647, %v188_v4  ;;  %vm957_vm13 = vcmp.lt.f32.partialorder %v249_v59, 1.0  ;;  %v131_v59 = vld [vmem:[#allocation5 + $0xb8] sm:$0xff] }
  0x2c   :  { %v629_v27 = vadd.f32 %v628_v17, %v566_v13  ;;  %v380_v30 = vmul.f32 0.5, %v188_v4  ;;  %v442_v31 = vmul.f32 %v378_v10, %v186_v48  ;;  %v722_v32 = vadd.f32 -0.5, %v250_v5  ;;  %v66_v48 = vld [vmem:[#allocation2 + $0xb0] sm:$0xff] }
  0x2d   :  { %v568_v33 = vsel %vm951_vm12, %v440_v11, %v720_v12  ;;  %v191_v34 = vsub.f32 %v63_v18, %v127_v19  ;;  %v253_v35 = vand.u32 2147483647, %v189_v14  ;;  %vm963_vm14 = vcmp.lt.f32.partialorder %v250_v5, 1.0  ;;  %v132_v5 = vld [vmem:[#allocation5 + $0xc0] sm:$0xff] }
  0x2e   :  { %v630_v37 = vadd.f32 %v629_v27, %v567_v23  ;;  %v381_v40 = vmul.f32 0.5, %v189_v14  ;;  %v443_v41 = vmul.f32 %v379_v20, %v187_v58  ;;  %v723_v42 = vadd.f32 -0.5, %v251_v15  ;;  %v67_v58 = vld [vmem:[#allocation2 + $0xb8] sm:$0xff] }
  0x2f   :  { %v569_v43 = vsel %vm957_vm13, %v441_v21, %v721_v22  ;;  %v192_v44 = vsub.f32 %v64_v28, %v128_v29  ;;  %v254_v45 = vand.u32 2147483647, %v190_v24  ;;  %vm969_vm15 = vcmp.lt.f32.partialorder %v251_v15, 1.0  ;;  %v133_v15 = vld [vmem:[#allocation5 + $0xc8] sm:$0xff] }
  0x30   :  { %v631_v47 = vadd.f32 %v630_v37, %v568_v33  ;;  %v382_v50 = vmul.f32 0.5, %v190_v24  ;;  %v444_v51 = vmul.f32 %v380_v30, %v188_v4  ;;  %v724_v52 = vadd.f32 -0.5, %v252_v25  ;;  %v68_v4 = vld [vmem:[#allocation2 + $0xc0] sm:$0xff] }
  0x31   :  { %v570_v53 = vsel %vm963_vm14, %v442_v31, %v722_v32  ;;  %v193_v54 = vsub.f32 %v65_v38, %v129_v39  ;;  %v255_v55 = vand.u32 2147483647, %v191_v34  ;;  %vm975_vm0 = vcmp.lt.f32.partialorder %v252_v25, 1.0  ;;  %v134_v25 = vld [vmem:[#allocation5 + $0xd0] sm:$0xff] }
  0x32   :  { %v632_v57 = vadd.f32 %v631_v47, %v569_v43  ;;  %v383_v60 = vmul.f32 0.5, %v191_v34  ;;  %v445_v61 = vmul.f32 %v381_v40, %v189_v14  ;;  %v725_v62 = vadd.f32 -0.5, %v253_v35  ;;  %v69_v14 = vld [vmem:[#allocation2 + $0xc8] sm:$0xff] }
  0x33   :  { %v571_v63 = vsel %vm969_vm15, %v443_v41, %v723_v42  ;;  %v194_v0 = vsub.f32 %v66_v48, %v130_v49  ;;  %v256_v1 = vand.u32 2147483647, %v192_v44  ;;  %vm981_vm1 = vcmp.lt.f32.partialorder %v253_v35, 1.0  ;;  %v135_v35 = vld [vmem:[#allocation5 + $0xd8] sm:$0xff] }
  0x34   :  { %v633_v3 = vadd.f32 %v632_v57, %v570_v53  ;;  %v384_v6 = vmul.f32 0.5, %v192_v44  ;;  %v446_v7 = vmul.f32 %v382_v50, %v190_v24  ;;  %v726_v8 = vadd.f32 -0.5, %v254_v45  ;;  %v70_v24 = vld [vmem:[#allocation2 + $0xd0] sm:$0xff] }
  0x35   :  { %v572_v9 = vsel %vm975_vm0, %v444_v51, %v724_v52  ;;  %v195_v10 = vsub.f32 %v67_v58, %v131_v59  ;;  %v257_v11 = vand.u32 2147483647, %v193_v54  ;;  %vm987_vm2 = vcmp.lt.f32.partialorder %v254_v45, 1.0  ;;  %v136_v45 = vld [vmem:[#allocation5 + $0xe0] sm:$0xff] }
  0x36   :  { %v634_v13 = vadd.f32 %v633_v3, %v571_v63  ;;  %v385_v16 = vmul.f32 0.5, %v193_v54  ;;  %v447_v17 = vmul.f32 %v383_v60, %v191_v34  ;;  %v727_v18 = vadd.f32 -0.5, %v255_v55  ;;  %v71_v34 = vld [vmem:[#allocation2 + $0xd8] sm:$0xff] }
  0x37   :  { %v573_v19 = vsel %vm981_vm1, %v445_v61, %v725_v62  ;;  %v196_v20 = vsub.f32 %v68_v4, %v132_v5  ;;  %v258_v21 = vand.u32 2147483647, %v194_v0  ;;  %vm993_vm3 = vcmp.lt.f32.partialorder %v255_v55, 1.0  ;;  %v137_v55 = vld [vmem:[#allocation5 + $0xe8] sm:$0xff] }
  0x38   :  { %v635_v23 = vadd.f32 %v634_v13, %v572_v9  ;;  %v386_v26 = vmul.f32 0.5, %v194_v0  ;;  %v448_v27 = vmul.f32 %v384_v6, %v192_v44  ;;  %v728_v28 = vadd.f32 -0.5, %v256_v1  ;;  %v72_v44 = vld [vmem:[#allocation2 + $0xe0] sm:$0xff] }
  0x39   :  { %v574_v29 = vsel %vm987_vm2, %v446_v7, %v726_v8  ;;  %v197_v30 = vsub.f32 %v69_v14, %v133_v15  ;;  %v259_v31 = vand.u32 2147483647, %v195_v10  ;;  %vm999_vm4 = vcmp.lt.f32.partialorder %v256_v1, 1.0  ;;  %v138_v1 = vld [vmem:[#allocation5 + $0xf0] sm:$0xff] }
  0x3a   :  { %v636_v33 = vadd.f32 %v635_v23, %v573_v19  ;;  %v387_v36 = vmul.f32 0.5, %v195_v10  ;;  %v449_v37 = vmul.f32 %v385_v16, %v193_v54  ;;  %v729_v38 = vadd.f32 -0.5, %v257_v11  ;;  %v73_v54 = vld [vmem:[#allocation2 + $0xe8] sm:$0xff] }
  0x3b   :  { %v575_v39 = vsel %vm993_vm3, %v447_v17, %v727_v18  ;;  %v198_v40 = vsub.f32 %v70_v24, %v134_v25  ;;  %v260_v41 = vand.u32 2147483647, %v196_v20  ;;  %vm1005_vm5 = vcmp.lt.f32.partialorder %v257_v11, 1.0  ;;  %v139_v11 = vld [vmem:[#allocation5 + $0xf8] sm:$0xff] }
  0x3c   :  { %v637_v43 = vadd.f32 %v636_v33, %v574_v29  ;;  %v388_v46 = vmul.f32 0.5, %v196_v20  ;;  %v450_v47 = vmul.f32 %v386_v26, %v194_v0  ;;  %v730_v48 = vadd.f32 -0.5, %v258_v21  ;;  %v74_v0 = vld [vmem:[#allocation2 + $0xf0] sm:$0xff] }
  0x3d   :  { %v576_v49 = vsel %vm999_vm4, %v448_v27, %v728_v28  ;;  %v199_v50 = vsub.f32 %v71_v34, %v135_v35  ;;  %v261_v51 = vand.u32 2147483647, %v197_v30  ;;  %vm1011_vm6 = vcmp.lt.f32.partialorder %v258_v21, 1.0  ;;  %v140_v21 = vld [vmem:[#allocation5 + $0x100] sm:$0xff] }
  0x3e   :  { %v638_v53 = vadd.f32 %v637_v43, %v575_v39  ;;  %v389_v56 = vmul.f32 0.5, %v197_v30  ;;  %v451_v57 = vmul.f32 %v387_v36, %v195_v10  ;;  %v731_v58 = vadd.f32 -0.5, %v259_v31  ;;  %v75_v10 = vld [vmem:[#allocation2 + $0xf8] sm:$0xff] }
  0x3f   :  { %v577_v59 = vsel %vm1005_vm5, %v449_v37, %v729_v38  ;;  %v200_v60 = vsub.f32 %v72_v44, %v136_v45  ;;  %v262_v61 = vand.u32 2147483647, %v198_v40  ;;  %vm1017_vm7 = vcmp.lt.f32.partialorder %v259_v31, 1.0  ;;  %v141_v31 = vld [vmem:[#allocation5 + $0x108] sm:$0xff] }
  0x40   :  { %v639_v63 = vadd.f32 %v638_v53, %v576_v49  ;;  %v390_v2 = vmul.f32 0.5, %v198_v40  ;;  %v452_v3 = vmul.f32 %v388_v46, %v196_v20  ;;  %v732_v4 = vadd.f32 -0.5, %v260_v41  ;;  %v76_v20 = vld [vmem:[#allocation2 + $0x100] sm:$0xff] }
  0x41   :  { %v578_v5 = vsel %vm1011_vm6, %v450_v47, %v730_v48  ;;  %v201_v6 = vsub.f32 %v73_v54, %v137_v55  ;;  %v263_v7 = vand.u32 2147483647, %v199_v50  ;;  %vm1023_vm8 = vcmp.lt.f32.partialorder %v260_v41, 1.0  ;;  %v142_v41 = vld [vmem:[#allocation5 + $0x110] sm:$0xff] }
  0x42   :  { %v640_v9 = vadd.f32 %v639_v63, %v577_v59  ;;  %v391_v12 = vmul.f32 0.5, %v199_v50  ;;  %v453_v13 = vmul.f32 %v389_v56, %v197_v30  ;;  %v733_v14 = vadd.f32 -0.5, %v261_v51  ;;  %v77_v30 = vld [vmem:[#allocation2 + $0x108] sm:$0xff] }
  0x43   :  { %v579_v15 = vsel %vm1017_vm7, %v451_v57, %v731_v58  ;;  %v202_v16 = vsub.f32 %v74_v0, %v138_v1  ;;  %v264_v17 = vand.u32 2147483647, %v200_v60  ;;  %vm1029_vm9 = vcmp.lt.f32.partialorder %v261_v51, 1.0  ;;  %v143_v51 = vld [vmem:[#allocation5 + $0x118] sm:$0xff] }
  0x44   :  { %v641_v19 = vadd.f32 %v640_v9, %v578_v5  ;;  %v392_v22 = vmul.f32 0.5, %v200_v60  ;;  %v454_v23 = vmul.f32 %v390_v2, %v198_v40  ;;  %v734_v24 = vadd.f32 -0.5, %v262_v61  ;;  %v78_v40 = vld [vmem:[#allocation2 + $0x110] sm:$0xff] }
  0x45   :  { %v580_v25 = vsel %vm1023_vm8, %v452_v3, %v732_v4  ;;  %v203_v26 = vsub.f32 %v75_v10, %v139_v11  ;;  %v265_v27 = vand.u32 2147483647, %v201_v6  ;;  %vm1035_vm10 = vcmp.lt.f32.partialorder %v262_v61, 1.0  ;;  %v144_v61 = vld [vmem:[#allocation5 + $0x120] sm:$0xff] }
  0x46   :  { %v642_v29 = vadd.f32 %v641_v19, %v579_v15  ;;  %v393_v32 = vmul.f32 0.5, %v201_v6  ;;  %v455_v33 = vmul.f32 %v391_v12, %v199_v50  ;;  %v735_v34 = vadd.f32 -0.5, %v263_v7  ;;  %v79_v50 = vld [vmem:[#allocation2 + $0x118] sm:$0xff] }
  0x47   :  { %v581_v35 = vsel %vm1029_vm9, %v453_v13, %v733_v14  ;;  %v204_v36 = vsub.f32 %v76_v20, %v140_v21  ;;  %v266_v37 = vand.u32 2147483647, %v202_v16  ;;  %vm1041_vm11 = vcmp.lt.f32.partialorder %v263_v7, 1.0  ;;  %v145_v7 = vld [vmem:[#allocation5 + $0x128] sm:$0xff] }
  0x48   :  { %v643_v39 = vadd.f32 %v642_v29, %v580_v25  ;;  %v394_v42 = vmul.f32 0.5, %v202_v16  ;;  %v456_v43 = vmul.f32 %v392_v22, %v200_v60  ;;  %v736_v44 = vadd.f32 -0.5, %v264_v17  ;;  %v80_v60 = vld [vmem:[#allocation2 + $0x120] sm:$0xff] }
  0x49   :  { %v582_v45 = vsel %vm1035_vm10, %v454_v23, %v734_v24  ;;  %v205_v46 = vsub.f32 %v77_v30, %v141_v31  ;;  %v267_v47 = vand.u32 2147483647, %v203_v26  ;;  %vm1047_vm12 = vcmp.lt.f32.partialorder %v264_v17, 1.0  ;;  %v146_v17 = vld [vmem:[#allocation5 + $0x130] sm:$0xff] }
  0x4a   :  { %v644_v49 = vadd.f32 %v643_v39, %v581_v35  ;;  %v395_v52 = vmul.f32 0.5, %v203_v26  ;;  %v457_v53 = vmul.f32 %v393_v32, %v201_v6  ;;  %v737_v54 = vadd.f32 -0.5, %v265_v27  ;;  %v81_v6 = vld [vmem:[#allocation2 + $0x128] sm:$0xff] }
  0x4b   :  { %v583_v55 = vsel %vm1041_vm11, %v455_v33, %v735_v34  ;;  %v206_v56 = vsub.f32 %v78_v40, %v142_v41  ;;  %v268_v57 = vand.u32 2147483647, %v204_v36  ;;  %vm1053_vm13 = vcmp.lt.f32.partialorder %v265_v27, 1.0  ;;  %v147_v27 = vld [vmem:[#allocation5 + $0x138] sm:$0xff] }
  0x4c   :  { %v645_v59 = vadd.f32 %v644_v49, %v582_v45  ;;  %v396_v62 = vmul.f32 0.5, %v204_v36  ;;  %v458_v63 = vmul.f32 %v394_v42, %v202_v16  ;;  %v738_v0 = vadd.f32 -0.5, %v266_v37  ;;  %v82_v16 = vld [vmem:[#allocation2 + $0x130] sm:$0xff] }
  0x4d   :  { %v584_v1 = vsel %vm1047_vm12, %v456_v43, %v736_v44  ;;  %v207_v2 = vsub.f32 %v79_v50, %v143_v51  ;;  %v269_v3 = vand.u32 2147483647, %v205_v46  ;;  %vm1059_vm14 = vcmp.lt.f32.partialorder %v266_v37, 1.0  ;;  %v148_v37 = vld [vmem:[#allocation5 + $0x140] sm:$0xff] }
  0x4e   :  { %v646_v5 = vadd.f32 %v645_v59, %v583_v55  ;;  %v397_v8 = vmul.f32 0.5, %v205_v46  ;;  %v459_v9 = vmul.f32 %v395_v52, %v203_v26  ;;  %v739_v10 = vadd.f32 -0.5, %v267_v47  ;;  %v83_v26 = vld [vmem:[#allocation2 + $0x138] sm:$0xff] }
  0x4f   :  { %v585_v11 = vsel %vm1053_vm13, %v457_v53, %v737_v54  ;;  %v208_v12 = vsub.f32 %v80_v60, %v144_v61  ;;  %v270_v13 = vand.u32 2147483647, %v206_v56  ;;  %vm1065_vm15 = vcmp.lt.f32.partialorder %v267_v47, 1.0  ;;  %v149_v47 = vld [vmem:[#allocation5 + $0x148] sm:$0xff] }
  0x50   :  { %v647_v15 = vadd.f32 %v646_v5, %v584_v1  ;;  %v398_v18 = vmul.f32 0.5, %v206_v56  ;;  %v460_v19 = vmul.f32 %v396_v62, %v204_v36  ;;  %v740_v20 = vadd.f32 -0.5, %v268_v57  ;;  %v84_v36 = vld [vmem:[#allocation2 + $0x140] sm:$0xff] }
  0x51   :  { %v586_v21 = vsel %vm1059_vm14, %v458_v63, %v738_v0  ;;  %v209_v22 = vsub.f32 %v81_v6, %v145_v7  ;;  %v271_v23 = vand.u32 2147483647, %v207_v2  ;;  %vm1071_vm0 = vcmp.lt.f32.partialorder %v268_v57, 1.0  ;;  %v150_v57 = vld [vmem:[#allocation5 + $0x150] sm:$0xff] }
  0x52   :  { %v648_v25 = vadd.f32 %v647_v15, %v585_v11  ;;  %v399_v28 = vmul.f32 0.5, %v207_v2  ;;  %v461_v29 = vmul.f32 %v397_v8, %v205_v46  ;;  %v741_v30 = vadd.f32 -0.5, %v269_v3  ;;  %v85_v46 = vld [vmem:[#allocation2 + $0x148] sm:$0xff] }
  0x53   :  { %v587_v31 = vsel %vm1065_vm15, %v459_v9, %v739_v10  ;;  %v210_v32 = vsub.f32 %v82_v16, %v146_v17  ;;  %v272_v33 = vand.u32 2147483647, %v208_v12  ;;  %vm1077_vm1 = vcmp.lt.f32.partialorder %v269_v3, 1.0  ;;  %v151_v3 = vld [vmem:[#allocation5 + $0x158] sm:$0xff] }
  0x54   :  { %v649_v35 = vadd.f32 %v648_v25, %v586_v21  ;;  %v400_v38 = vmul.f32 0.5, %v208_v12  ;;  %v462_v39 = vmul.f32 %v398_v18, %v206_v56  ;;  %v742_v40 = vadd.f32 -0.5, %v270_v13  ;;  %v86_v56 = vld [vmem:[#allocation2 + $0x150] sm:$0xff] }
  0x55   :  { %v588_v41 = vsel %vm1071_vm0, %v460_v19, %v740_v20  ;;  %v211_v42 = vsub.f32 %v83_v26, %v147_v27  ;;  %v273_v43 = vand.u32 2147483647, %v209_v22  ;;  %vm1083_vm2 = vcmp.lt.f32.partialorder %v270_v13, 1.0  ;;  %v152_v13 = vld [vmem:[#allocation5 + $0x160] sm:$0xff] }
  0x56   :  { %v650_v45 = vadd.f32 %v649_v35, %v587_v31  ;;  %v401_v48 = vmul.f32 0.5, %v209_v22  ;;  %v463_v49 = vmul.f32 %v399_v28, %v207_v2  ;;  %v743_v50 = vadd.f32 -0.5, %v271_v23  ;;  %v87_v2 = vld [vmem:[#allocation2 + $0x158] sm:$0xff] }
  0x57   :  { %v589_v51 = vsel %vm1077_vm1, %v461_v29, %v741_v30  ;;  %v212_v52 = vsub.f32 %v84_v36, %v148_v37  ;;  %v274_v53 = vand.u32 2147483647, %v210_v32  ;;  %vm1089_vm3 = vcmp.lt.f32.partialorder %v271_v23, 1.0  ;;  %v153_v23 = vld [vmem:[#allocation5 + $0x168] sm:$0xff] }
  0x58   :  { %v651_v55 = vadd.f32 %v650_v45, %v588_v41  ;;  %v402_v58 = vmul.f32 0.5, %v210_v32  ;;  %v464_v59 = vmul.f32 %v400_v38, %v208_v12  ;;  %v744_v60 = vadd.f32 -0.5, %v272_v33  ;;  %v88_v12 = vld [vmem:[#allocation2 + $0x160] sm:$0xff] }
  0x59   :  { %v590_v61 = vsel %vm1083_vm2, %v462_v39, %v742_v40  ;;  %v213_v62 = vsub.f32 %v85_v46, %v149_v47  ;;  %v275_v63 = vand.u32 2147483647, %v211_v42  ;;  %vm1095_vm4 = vcmp.lt.f32.partialorder %v272_v33, 1.0  ;;  %v154_v33 = vld [vmem:[#allocation5 + $0x170] sm:$0xff] }
  0x5a   :  { %v652_v1 = vadd.f32 %v651_v55, %v589_v51  ;;  %v403_v4 = vmul.f32 0.5, %v211_v42  ;;  %v465_v5 = vmul.f32 %v401_v48, %v209_v22  ;;  %v745_v6 = vadd.f32 -0.5, %v273_v43  ;;  %v89_v22 = vld [vmem:[#allocation2 + $0x168] sm:$0xff] }
  0x5b   :  { %v591_v7 = vsel %vm1089_vm3, %v463_v49, %v743_v50  ;;  %v214_v8 = vsub.f32 %v86_v56, %v150_v57  ;;  %v276_v9 = vand.u32 2147483647, %v212_v52  ;;  %vm1101_vm5 = vcmp.lt.f32.partialorder %v273_v43, 1.0  ;;  %v155_v43 = vld [vmem:[#allocation5 + $0x178] sm:$0xff] }
  0x5c   :  { %v653_v11 = vadd.f32 %v652_v1, %v590_v61  ;;  %v404_v14 = vmul.f32 0.5, %v212_v52  ;;  %v466_v15 = vmul.f32 %v402_v58, %v210_v32  ;;  %v746_v16 = vadd.f32 -0.5, %v274_v53  ;;  %v90_v32 = vld [vmem:[#allocation2 + $0x170] sm:$0xff] }
  0x5d   :  { %v592_v17 = vsel %vm1095_vm4, %v464_v59, %v744_v60  ;;  %v215_v18 = vsub.f32 %v87_v2, %v151_v3  ;;  %v277_v19 = vand.u32 2147483647, %v213_v62  ;;  %vm1107_vm6 = vcmp.lt.f32.partialorder %v274_v53, 1.0  ;;  %v156_v53 = vld [vmem:[#allocation5 + $0x180] sm:$0xff] }
  0x5e   :  { %v654_v21 = vadd.f32 %v653_v11, %v591_v7  ;;  %v405_v24 = vmul.f32 0.5, %v213_v62  ;;  %v467_v25 = vmul.f32 %v403_v4, %v211_v42  ;;  %v747_v26 = vadd.f32 -0.5, %v275_v63  ;;  %v91_v42 = vld [vmem:[#allocation2 + $0x178] sm:$0xff] }
  0x5f   :  { %v593_v27 = vsel %vm1101_vm5, %v465_v5, %v745_v6  ;;  %v216_v28 = vsub.f32 %v88_v12, %v152_v13  ;;  %v278_v29 = vand.u32 2147483647, %v214_v8  ;;  %vm1113_vm7 = vcmp.lt.f32.partialorder %v275_v63, 1.0  ;;  %v157_v63 = vld [vmem:[#allocation5 + $0x188] sm:$0xff] }
  0x60   :  { %v655_v31 = vadd.f32 %v654_v21, %v592_v17  ;;  %v406_v34 = vmul.f32 0.5, %v214_v8  ;;  %v468_v35 = vmul.f32 %v404_v14, %v212_v52  ;;  %v748_v36 = vadd.f32 -0.5, %v276_v9  ;;  %v92_v52 = vld [vmem:[#allocation2 + $0x180] sm:$0xff] }
  0x61   :  { %v594_v37 = vsel %vm1107_vm6, %v466_v15, %v746_v16  ;;  %v217_v38 = vsub.f32 %v89_v22, %v153_v23  ;;  %v279_v39 = vand.u32 2147483647, %v215_v18  ;;  %vm1119_vm8 = vcmp.lt.f32.partialorder %v276_v9, 1.0  ;;  %v158_v9 = vld [vmem:[#allocation5 + $0x190] sm:$0xff] }
  0x62   :  { %v656_v41 = vadd.f32 %v655_v31, %v593_v27  ;;  %v407_v44 = vmul.f32 0.5, %v215_v18  ;;  %v469_v45 = vmul.f32 %v405_v24, %v213_v62  ;;  %v749_v46 = vadd.f32 -0.5, %v277_v19  ;;  %v93_v62 = vld [vmem:[#allocation2 + $0x188] sm:$0xff] }
  0x63   :  { %v595_v47 = vsel %vm1113_vm7, %v467_v25, %v747_v26  ;;  %v218_v48 = vsub.f32 %v90_v32, %v154_v33  ;;  %v280_v49 = vand.u32 2147483647, %v216_v28  ;;  %vm1125_vm9 = vcmp.lt.f32.partialorder %v277_v19, 1.0  ;;  %v159_v19 = vld [vmem:[#allocation5 + $0x198] sm:$0xff] }
  0x64   :  { %v657_v51 = vadd.f32 %v656_v41, %v594_v37  ;;  %v408_v54 = vmul.f32 0.5, %v216_v28  ;;  %v470_v55 = vmul.f32 %v406_v34, %v214_v8  ;;  %v750_v56 = vadd.f32 -0.5, %v278_v29  ;;  %v94_v8 = vld [vmem:[#allocation2 + $0x190] sm:$0xff] }
  0x65   :  { %v596_v57 = vsel %vm1119_vm8, %v468_v35, %v748_v36  ;;  %v219_v58 = vsub.f32 %v91_v42, %v155_v43  ;;  %v281_v59 = vand.u32 2147483647, %v217_v38  ;;  %vm1131_vm10 = vcmp.lt.f32.partialorder %v278_v29, 1.0  ;;  %v160_v29 = vld [vmem:[#allocation5 + $0x1a0] sm:$0xff] }
  0x66   :  { %v658_v61 = vadd.f32 %v657_v51, %v595_v47  ;;  %v409_v0 = vmul.f32 0.5, %v217_v38  ;;  %v471_v1 = vmul.f32 %v407_v44, %v215_v18  ;;  %v751_v2 = vadd.f32 -0.5, %v279_v39  ;;  %v95_v18 = vld [vmem:[#allocation2 + $0x198] sm:$0xff] }
  0x67   :  { %v597_v3 = vsel %vm1125_vm9, %v469_v45, %v749_v46  ;;  %v220_v4 = vsub.f32 %v92_v52, %v156_v53  ;;  %v282_v5 = vand.u32 2147483647, %v218_v48  ;;  %vm1137_vm11 = vcmp.lt.f32.partialorder %v279_v39, 1.0  ;;  %v161_v39 = vld [vmem:[#allocation5 + $0x1a8] sm:$0xff] }
  0x68   :  { %v659_v7 = vadd.f32 %v658_v61, %v596_v57  ;;  %v410_v10 = vmul.f32 0.5, %v218_v48  ;;  %v472_v11 = vmul.f32 %v408_v54, %v216_v28  ;;  %v752_v12 = vadd.f32 -0.5, %v280_v49  ;;  %v96_v28 = vld [vmem:[#allocation2 + $0x1a0] sm:$0xff] }
  0x69   :  { %v598_v13 = vsel %vm1131_vm10, %v470_v55, %v750_v56  ;;  %v221_v14 = vsub.f32 %v93_v62, %v157_v63  ;;  %v283_v15 = vand.u32 2147483647, %v219_v58  ;;  %vm1143_vm12 = vcmp.lt.f32.partialorder %v280_v49, 1.0  ;;  %v162_v49 = vld [vmem:[#allocation5 + $0x1b0] sm:$0xff] }
  0x6a   :  { %v660_v17 = vadd.f32 %v659_v7, %v597_v3  ;;  %v411_v20 = vmul.f32 0.5, %v219_v58  ;;  %v473_v21 = vmul.f32 %v409_v0, %v217_v38  ;;  %v753_v22 = vadd.f32 -0.5, %v281_v59  ;;  %v97_v38 = vld [vmem:[#allocation2 + $0x1a8] sm:$0xff] }
  0x6b   :  { %v599_v23 = vsel %vm1137_vm11, %v471_v1, %v751_v2  ;;  %v222_v24 = vsub.f32 %v94_v8, %v158_v9  ;;  %v284_v25 = vand.u32 2147483647, %v220_v4  ;;  %vm1149_vm13 = vcmp.lt.f32.partialorder %v281_v59, 1.0  ;;  %v163_v59 = vld [vmem:[#allocation5 + $0x1b8] sm:$0xff] }
  0x6c   :  { %v661_v27 = vadd.f32 %v660_v17, %v598_v13  ;;  %v412_v30 = vmul.f32 0.5, %v220_v4  ;;  %v474_v31 = vmul.f32 %v410_v10, %v218_v48  ;;  %v754_v32 = vadd.f32 -0.5, %v282_v5  ;;  %v98_v48 = vld [vmem:[#allocation2 + $0x1b0] sm:$0xff] }
  0x6d   :  { %v600_v33 = vsel %vm1143_vm12, %v472_v11, %v752_v12  ;;  %v223_v34 = vsub.f32 %v95_v18, %v159_v19  ;;  %v285_v35 = vand.u32 2147483647, %v221_v14  ;;  %vm1155_vm14 = vcmp.lt.f32.partialorder %v282_v5, 1.0  ;;  %v164_v5 = vld [vmem:[#allocation5 + $0x1c0] sm:$0xff] }
  0x6e   :  { %v662_v37 = vadd.f32 %v661_v27, %v599_v23  ;;  %v413_v40 = vmul.f32 0.5, %v221_v14  ;;  %v475_v41 = vmul.f32 %v411_v20, %v219_v58  ;;  %v755_v42 = vadd.f32 -0.5, %v283_v15  ;;  %v99_v58 = vld [vmem:[#allocation2 + $0x1b8] sm:$0xff] }
  0x6f   :  { %v601_v43 = vsel %vm1149_vm13, %v473_v21, %v753_v22  ;;  %v224_v44 = vsub.f32 %v96_v28, %v160_v29  ;;  %v286_v45 = vand.u32 2147483647, %v222_v24  ;;  %vm1161_vm15 = vcmp.lt.f32.partialorder %v283_v15, 1.0  ;;  %v165_v15 = vld [vmem:[#allocation5 + $0x1c8] sm:$0xff] }
  0x70   :  { %v663_v47 = vadd.f32 %v662_v37, %v600_v33  ;;  %v414_v50 = vmul.f32 0.5, %v222_v24  ;;  %v476_v51 = vmul.f32 %v412_v30, %v220_v4  ;;  %v756_v52 = vadd.f32 -0.5, %v284_v25  ;;  %v100_v4 = vld [vmem:[#allocation2 + $0x1c0] sm:$0xff] }
  0x71   :  { %v602_v53 = vsel %vm1155_vm14, %v474_v31, %v754_v32  ;;  %v225_v54 = vsub.f32 %v97_v38, %v161_v39  ;;  %v287_v55 = vand.u32 2147483647, %v223_v34  ;;  %vm1167_vm0 = vcmp.lt.f32.partialorder %v284_v25, 1.0  ;;  %v166_v25 = vld [vmem:[#allocation5 + $0x1d0] sm:$0xff] }
  0x72   :  { %v664_v57 = vadd.f32 %v663_v47, %v601_v43  ;;  %v415_v60 = vmul.f32 0.5, %v223_v34  ;;  %v477_v61 = vmul.f32 %v413_v40, %v221_v14  ;;  %v757_v62 = vadd.f32 -0.5, %v285_v35  ;;  %v101_v14 = vld [vmem:[#allocation2 + $0x1c8] sm:$0xff] }
  0x73   :  { %v603_v63 = vsel %vm1161_vm15, %v475_v41, %v755_v42  ;;  %v226_v0 = vsub.f32 %v98_v48, %v162_v49  ;;  %v288_v1 = vand.u32 2147483647, %v224_v44  ;;  %vm1173_vm1 = vcmp.lt.f32.partialorder %v285_v35, 1.0  ;;  %v167_v35 = vld [vmem:[#allocation5 + $0x1d8] sm:$0xff] }
  0x74   :  { %v665_v3 = vadd.f32 %v664_v57, %v602_v53  ;;  %v416_v6 = vmul.f32 0.5, %v224_v44  ;;  %v478_v7 = vmul.f32 %v414_v50, %v222_v24  ;;  %v758_v8 = vadd.f32 -0.5, %v286_v45  ;;  %v102_v24 = vld [vmem:[#allocation2 + $0x1d0] sm:$0xff] }
  0x75   :  { %v604_v9 = vsel %vm1167_vm0, %v476_v51, %v756_v52  ;;  %v227_v10 = vsub.f32 %v99_v58, %v163_v59  ;;  %v289_v11 = vand.u32 2147483647, %v225_v54  ;;  %vm1179_vm2 = vcmp.lt.f32.partialorder %v286_v45, 1.0  ;;  %v168_v45 = vld [vmem:[#allocation5 + $0x1e0] sm:$0xff] }
  0x76   :  { %v666_v13 = vadd.f32 %v665_v3, %v603_v63  ;;  %v417_v16 = vmul.f32 0.5, %v225_v54  ;;  %v479_v17 = vmul.f32 %v415_v60, %v223_v34  ;;  %v759_v18 = vadd.f32 -0.5, %v287_v55  ;;  %v103_v34 = vld [vmem:[#allocation2 + $0x1d8] sm:$0xff] }
  0x77   :  { %v605_v19 = vsel %vm1173_vm1, %v477_v61, %v757_v62  ;;  %v228_v20 = vsub.f32 %v100_v4, %v164_v5  ;;  %v290_v21 = vand.u32 2147483647, %v226_v0  ;;  %vm1185_vm3 = vcmp.lt.f32.partialorder %v287_v55, 1.0  ;;  %v169_v55 = vld [vmem:[#allocation5 + $0x1e8] sm:$0xff] }
  0x78   :  { %v667_v23 = vadd.f32 %v666_v13, %v604_v9  ;;  %v418_v26 = vmul.f32 0.5, %v226_v0  ;;  %v480_v27 = vmul.f32 %v416_v6, %v224_v44  ;;  %v760_v28 = vadd.f32 -0.5, %v288_v1  ;;  %v104_v44 = vld [vmem:[#allocation2 + $0x1e0] sm:$0xff] }
  0x79   :  { %v606_v29 = vsel %vm1179_vm2, %v478_v7, %v758_v8  ;;  %v229_v30 = vsub.f32 %v101_v14, %v165_v15  ;;  %v291_v31 = vand.u32 2147483647, %v227_v10  ;;  %vm1191_vm4 = vcmp.lt.f32.partialorder %v288_v1, 1.0  ;;  %v170_v1 = vld [vmem:[#allocation5 + $0x1f0] sm:$0xff] }
  0x7a   :  { %v668_v33 = vadd.f32 %v667_v23, %v605_v19  ;;  %v419_v36 = vmul.f32 0.5, %v227_v10  ;;  %v481_v37 = vmul.f32 %v417_v16, %v225_v54  ;;  %v761_v38 = vadd.f32 -0.5, %v289_v11  ;;  %v105_v54 = vld [vmem:[#allocation2 + $0x1e8] sm:$0xff] }
  0x7b   :  { %v607_v39 = vsel %vm1185_vm3, %v479_v17, %v759_v18  ;;  %v230_v40 = vsub.f32 %v102_v24, %v166_v25  ;;  %v292_v41 = vand.u32 2147483647, %v228_v20  ;;  %vm1197_vm5 = vcmp.lt.f32.partialorder %v289_v11, 1.0  ;;  %v171_v11 = vld [vmem:[#allocation5 + $0x1f8] sm:$0xff] }
  0x7c   :  { %v669_v43 = vadd.f32 %v668_v33, %v606_v29  ;;  %v420_v46 = vmul.f32 0.5, %v228_v20  ;;  %v482_v47 = vmul.f32 %v418_v26, %v226_v0  ;;  %v762_v48 = vadd.f32 -0.5, %v290_v21  ;;  %v106_v0 = vld [vmem:[#allocation2 + $0x1f0] sm:$0xff] }
  0x7d   :  { %v608_v49 = vsel %vm1191_vm4, %v480_v27, %v760_v28  ;;  %v231_v50 = vsub.f32 %v103_v34, %v167_v35  ;;  %v293_v51 = vand.u32 2147483647, %v229_v30  ;;  %vm1203_vm6 = vcmp.lt.f32.partialorder %v290_v21, 1.0 }
  0x7e   :  { %v670_v53 = vadd.f32 %v669_v43, %v607_v39  ;;  %v421_v56 = vmul.f32 0.5, %v229_v30  ;;  %v483_v57 = vmul.f32 %v419_v36, %v227_v10  ;;  %v763_v58 = vadd.f32 -0.5, %v291_v31  ;;  %v107_v10 = vld [vmem:[#allocation2 + $0x1f8] sm:$0xff] }
  0x7f   :  { %v609_v59 = vsel %vm1197_vm5, %v481_v37, %v761_v38  ;;  %v232_v60 = vsub.f32 %v104_v44, %v168_v45  ;;  %v294_v61 = vand.u32 2147483647, %v230_v40  ;;  %vm1209_vm7 = vcmp.lt.f32.partialorder %v291_v31, 1.0 }
  0x80   :  { %v671_v63 = vadd.f32 %v670_v53, %v608_v49  ;;  %v422_v2 = vmul.f32 0.5, %v230_v40  ;;  %v484_v3 = vmul.f32 %v420_v46, %v228_v20  ;;  %v764_v4 = vadd.f32 -0.5, %v292_v41 }
  0x81   :  { %v610_v5 = vsel %vm1203_vm6, %v482_v47, %v762_v48  ;;  %v233_v6 = vsub.f32 %v105_v54, %v169_v55  ;;  %v295_v7 = vand.u32 2147483647, %v231_v50  ;;  %vm1215_vm8 = vcmp.lt.f32.partialorder %v292_v41, 1.0 }
  0x82   :  { %v672_v9 = vadd.f32 %v671_v63, %v609_v59  ;;  %v423_v12 = vmul.f32 0.5, %v231_v50  ;;  %v485_v13 = vmul.f32 %v421_v56, %v229_v30  ;;  %v765_v14 = vadd.f32 -0.5, %v293_v51 }
  0x83   :  { %v611_v15 = vsel %vm1209_vm7, %v483_v57, %v763_v58  ;;  %v234_v16 = vsub.f32 %v106_v0, %v170_v1  ;;  %v296_v17 = vand.u32 2147483647, %v232_v60  ;;  %vm1221_vm9 = vcmp.lt.f32.partialorder %v293_v51, 1.0 }
  0x84   :  { %v673_v19 = vadd.f32 %v672_v9, %v610_v5  ;;  %v424_v20 = vmul.f32 0.5, %v232_v60  ;;  %v486_v21 = vmul.f32 %v422_v2, %v230_v40  ;;  %v766_v22 = vadd.f32 -0.5, %v294_v61 }
  0x85   :  { %v612_v23 = vsel %vm1215_vm8, %v484_v3, %v764_v4  ;;  %v235_v24 = vsub.f32 %v107_v10, %v171_v11  ;;  %v297_v25 = vand.u32 2147483647, %v233_v6  ;;  %vm1227_vm10 = vcmp.lt.f32.partialorder %v294_v61, 1.0 }
  0x86   :  { %v674_v27 = vadd.f32 %v673_v19, %v611_v15  ;;  %v425_v28 = vmul.f32 0.5, %v233_v6  ;;  %v487_v29 = vmul.f32 %v423_v12, %v231_v50  ;;  %v767_v30 = vadd.f32 -0.5, %v295_v7 }
  0x87   :  { %v613_v31 = vsel %vm1221_vm9, %v485_v13, %v765_v14  ;;  %v298_v32 = vand.u32 2147483647, %v234_v16  ;;  %vm1233_vm11 = vcmp.lt.f32.partialorder %v295_v7, 1.0  ;;  %v426_v35 = vmul.f32 0.5, %v234_v16 }
  0x88   :  { %v675_v34 = vadd.f32 %v674_v27, %v612_v23  ;;  %v488_v36 = vmul.f32 %v424_v20, %v232_v60  ;;  %v768_v37 = vadd.f32 -0.5, %v296_v17  ;;  %v614_v38 = vsel %vm1227_vm10, %v486_v21, %v766_v22 }
  0x89   :  { %v299_v39 = vand.u32 2147483647, %v235_v24  ;;  %vm1239_vm12 = vcmp.lt.f32.partialorder %v296_v17, 1.0  ;;  %v427_v42 = vmul.f32 0.5, %v235_v24  ;;  %v489_v43 = vmul.f32 %v425_v28, %v233_v6 }
  0x8a   :  { %v676_v41 = vadd.f32 %v675_v34, %v613_v31  ;;  %v769_v44 = vadd.f32 -0.5, %v297_v25  ;;  %v615_v45 = vsel %vm1233_vm11, %v487_v29, %v767_v30  ;;  %vm361_vm13 = vcmp.lt.f32.partialorder %v297_v25, 1.0 }
  0x8b   :  { %v490_v47 = vmul.f32 %v426_v35, %v234_v16  ;;  %v770_v48 = vadd.f32 -0.5, %v298_v32  ;;  %v616_v49 = vsel %vm1239_vm12, %v488_v36, %v768_v37  ;;  %vm362_vm14 = vcmp.lt.f32.partialorder %v298_v32, 1.0 }
  0x8c   :  { %v677_v46 = vadd.f32 %v676_v41, %v614_v38  ;;  %v491_v51 = vmul.f32 %v427_v42, %v235_v24  ;;  %v771_v52 = vadd.f32 -0.5, %v299_v39  ;;  %v617_v53 = vsel %vm361_vm13, %v489_v43, %v769_v44 }
  0x8d   :  { %vm363_vm15 = vcmp.lt.f32.partialorder %v299_v39, 1.0  ;;  %v618_v55 = vsel %vm362_vm14, %v490_v47, %v770_v48 }
  0x8e   :  { %v678_v50 = vadd.f32 %v677_v46, %v615_v45  ;;  %v619_v57 = vsel %vm363_vm15, %v491_v51, %v771_v52 }
  0x90   :  { %v679_v54 = vadd.f32 %v678_v50, %v616_v49 }
  0x92   :  { %v680_v56 = vadd.f32 %v679_v54, %v617_v53 }
  0x94   :  { %v681_v58 = vadd.f32 %v680_v56, %v618_v55 }
  0x96   :  { %v682_v59 = vadd.f32 %v681_v58, %v619_v57 }
  0x98   :  { %v683_v60 = vrot.slane %v682_v59, 4 }
  0x9a   :  { %v684_v61 = vadd.f32 %v683_v60, %v682_v59 }
  0x9c   :  { %v685_v62 = vrot.slane %v684_v61, 2 }
  0x9e   :  { %v686_v63 = vadd.f32 %v685_v62, %v684_v61 }
  0xa0   :  { %v687_v0 = vrot.slane %v686_v63, 1 }
  0xa2   :  { %v688_v1 = vadd.f32 %v687_v0, %v686_v63 }
  0xa4   :  { %689 = vst [vmem:[#allocation7] sm:$0x1] %v688_v1 }
  0xa5   :  { %700 = dma.vmem_to_hbm [thread:$0]  %s696_s1, 16, %s698_s23, [#allocation4]  }
  0xa6   :  { %853 = dma.done.wait [#allocation4], 16  }
  0xa7   :  { %854 = vsyncadd [#allocation4], 4294967280 }
  0xa8   :  { %705 = vsyncpa [#allocation3], 1 }
  0xa9   :  { %706 = vsyncpa [#allocation6], 1 }
  0xaa   :  { %707 = vsyncpa [#allocation4], 1 }

</bundles_post_ra>
